<compile_context>
chip_gen: v6e
topology: v6e:2x2x1
jax: 0.10.0
libtpu: 0.0.40
codegen_flags: <defaults>
</compile_context>

<pallas_src>
import math

import jax
import jax.numpy as jnp
from jax.experimental import pallas as pl
from jax.experimental.pallas import tpu as pltpu

LANE = 128  # TPU lane width: pad feature dims to a multiple of this.


def _round_up(x, m):
    return ((x + m - 1) // m) * m


def actor_forward_kernel(x_ref, w1_ref, b1_ref, w2_ref, b2_ref, o_ref):
    # Layer 1: bf16 matmul on the MXU, f32 accumulate, f32 bias + tanh (VPU/EUP).
    x = x_ref[...].astype(jnp.bfloat16)
    h1 = jnp.tanh(
        jnp.dot(x, w1_ref[...], preferred_element_type=jnp.float32) + b1_ref[...]
    )
    # Layer 2: same structure, feeding the previous f32 activations as bf16.
    h2 = jnp.tanh(
        jnp.dot(h1.astype(jnp.bfloat16), w2_ref[...],
                preferred_element_type=jnp.float32) + b2_ref[...]
    )
    o_ref[...] = h2.astype(o_ref.dtype)
    # TODO(synk): pi() (l3 projection + softmax) is not part of forward(); it could
    # be fused here as an extra output if a caller needs it.


def actor_forward(state, w1_p, b1_p, w2_p, b2_p, *, net_width, tm=128):
    """Runs the fused l1/l2 forward pass.

    state : (B, state_dim) float32
    w1_p  : (state_dim, Wp) bfloat16   (pre-transposed, lane-padded)
    w2_p  : (Wp, Wp)        bfloat16
    b1_p, b2_p : (1, Wp)    float32    (zero in padded columns)
    Returns (B, net_width) float32.
    """
    batch, state_dim = state.shape
    width_p = w1_p.shape[1]

    # Pick a batch tile: multiple of 8 that divides the batch (or the full batch).
    if batch % tm != 0:
        tm = batch
    grid = (batch // tm,)

    out_padded = pl.pallas_call(
        actor_forward_kernel,
        grid=grid,
        in_specs=[
            pl.BlockSpec((tm, state_dim), lambda i: (i, 0)),   # streamed batch tile
            pl.BlockSpec(w1_p.shape, lambda i: (0, 0)),        # resident weights
            pl.BlockSpec(b1_p.shape, lambda i: (0, 0)),
            pl.BlockSpec(w2_p.shape, lambda i: (0, 0)),
            pl.BlockSpec(b2_p.shape, lambda i: (0, 0)),
        ],
        out_specs=pl.BlockSpec((tm, width_p), lambda i: (i, 0)),
        out_shape=jax.ShapeDtypeStruct((batch, width_p), jnp.float32),
        compiler_params=pltpu.CompilerParams(
            dimension_semantics=("parallel",),  # batch tiles are independent
        ),
    )(state, w1_p, b1_p, w2_p, b2_p)

    # Drop the lane-padding columns outside the kernel (cheap XLA slice).
    return out_padded[:, :net_width]


def init_linear(key, in_features, out_features):
    """nn.Linear-style init U(-1/sqrt(fan_in), 1/sqrt(fan_in)).

    Returns weight transposed to (in_features, out_features) and bias (1, out), f32.
    """
    k_w, k_b = jax.random.split(key)
    bound = 1.0 / math.sqrt(in_features)
    w_t = jax.random.uniform(
        k_w, (in_features, out_features), jnp.float32, -bound, bound
    )
    b = jax.random.uniform(k_b, (1, out_features), jnp.float32, -bound, bound)
    return w_t, b


def prepare_params(w1_t, b1, w2_t, b2, net_width):
    """Pad the hidden width up to a lane multiple and cast weights to bf16.

    Padded columns get zero weight and zero bias, so the padded activations are
    exactly tanh(0) = 0 and never contaminate the logical outputs.
    """
    width_p = _round_up(net_width, LANE)
    pad = width_p - net_width

    w1_p = jnp.pad(w1_t, ((0, 0), (0, pad))).astype(jnp.bfloat16)
    b1_p = jnp.pad(b1, ((0, 0), (0, pad))).astype(jnp.float32)
    w2_p = jnp.pad(w2_t, ((0, pad), (0, pad))).astype(jnp.bfloat16)
    b2_p = jnp.pad(b2, ((0, 0), (0, pad))).astype(jnp.float32)
    return w1_p, b1_p, w2_p, b2_p


if __name__ == "__main__":
    # Actor(state_dim, action_dim, net_width); action_dim only feeds l3 (unused
    # in forward()). Batch is large enough to exercise the batch grid (2 tiles).
    batch = 256
    state_dim = 16
    net_width = 32
    action_dim = 8  # TODO(synk): only used by pi(), which forward() does not call.

    key = jax.random.PRNGKey(0)
    k_x, k_l1, k_l2 = jax.random.split(key, 3)

    state = jax.random.normal(k_x, (batch, state_dim), jnp.float32)
    w1_t, b1 = init_linear(k_l1, state_dim, net_width)
    w2_t, b2 = init_linear(k_l2, net_width, net_width)

    w1_p, b1_p, w2_p, b2_p = prepare_params(w1_t, b1, w2_t, b2, net_width)

    out = actor_forward(state, w1_p, b1_p, w2_p, b2_p, net_width=net_width)
    out = jax.block_until_ready(out)
    assert out.shape == (batch, net_width)

    # Reference 1: same bf16-operand / f32-accumulate path in pure JAX (tight).
    xb = state.astype(jnp.bfloat16)
    r1 = jnp.tanh(jnp.dot(xb, w1_p, preferred_element_type=jnp.float32) + b1_p)
    r2 = jnp.tanh(
        jnp.dot(r1.astype(jnp.bfloat16), w2_p, preferred_element_type=jnp.float32)
        + b2_p
    )
    ref_bf16 = r2[:, :net_width]
    assert jnp.allclose(out, ref_bf16, atol=2e-3, rtol=2e-3)

    # Reference 2: full f32 math (loose bound — bf16 quantization of operands).
    ref_f32 = jnp.tanh(jnp.tanh(state @ w1_t + b1) @ w2_t + b2)
    assert jnp.allclose(out, ref_f32, atol=5e-2, rtol=5e-2)

    print("KERNEL_OK")
</pallas_src>

<mosaic_0001>
module attributes {stable_mosaic.version = 11 : i64} {
  func.func @actor_forward_kernel(%arg0: i32, %arg1: memref<128x16xf32, #tpu.memory_space<vmem>>, %arg2: memref<16x128xbf16, #tpu.memory_space<vmem>>, %arg3: memref<1x128xf32, #tpu.memory_space<vmem>>, %arg4: memref<128x128xbf16, #tpu.memory_space<vmem>>, %arg5: memref<1x128xf32, #tpu.memory_space<vmem>>, %arg6: memref<128x128xf32, #tpu.memory_space<vmem>>) attributes {dimension_semantics = [#tpu.dimension_semantics<parallel>], iteration_bounds = array<i64: 2>, scalar_prefetch = 0 : i64, scratch_operands = 0 : i64, tpu.core_type = #tpu.core_type<tc>, window_params = [{transform_indices = @transform_0, window_bounds = array<i64: 128, 16>}, {pipeline_mode = #tpu.pipeline_mode<synchronous>, transform_indices = @transform_1, window_bounds = array<i64: 16, 128>}, {pipeline_mode = #tpu.pipeline_mode<synchronous>, transform_indices = @transform_2, window_bounds = array<i64: 1, 128>}, {pipeline_mode = #tpu.pipeline_mode<synchronous>, transform_indices = @transform_3, window_bounds = array<i64: 128, 128>}, {pipeline_mode = #tpu.pipeline_mode<synchronous>, transform_indices = @transform_4, window_bounds = array<i64: 1, 128>}, {transform_indices = @transform_5, window_bounds = array<i64: 128, 128>}]} {
    %c0 = arith.constant 0 : index
    %c0_0 = arith.constant 0 : index
    %0 = vector.load %arg1[%c0, %c0_0] : memref<128x16xf32, #tpu.memory_space<vmem>>, vector<128x16xf32>
    %1 = arith.truncf %0 : vector<128x16xf32> to vector<128x16xbf16>
    %c0_1 = arith.constant 0 : index
    %c0_2 = arith.constant 0 : index
    %2 = vector.load %arg2[%c0_1, %c0_2] : memref<16x128xbf16, #tpu.memory_space<vmem>>, vector<16x128xbf16>
    %cst = arith.constant dense<0.000000e+00> : vector<128x128xf32>
    %3 = tpu.matmul %1, %2, %cst {dimension_numbers = #tpu.dot_dimension_numbers<[1], [0], [0], [1], [0, 0, 1, 1], [], []>} : vector<128x16xbf16>, vector<16x128xbf16>, vector<128x128xf32> -> vector<128x128xf32>
    %c0_3 = arith.constant 0 : index
    %c0_4 = arith.constant 0 : index
    %4 = vector.load %arg3[%c0_3, %c0_4] : memref<1x128xf32, #tpu.memory_space<vmem>>, vector<1x128xf32>
    %5 = vector.broadcast %4 : vector<1x128xf32> to vector<128x128xf32>
    %6 = arith.addf %3, %5 : vector<128x128xf32>
    %7 = math.tanh %6 : vector<128x128xf32>
    %8 = arith.truncf %7 : vector<128x128xf32> to vector<128x128xbf16>
    %c0_5 = arith.constant 0 : index
    %c0_6 = arith.constant 0 : index
    %9 = vector.load %arg4[%c0_5, %c0_6] : memref<128x128xbf16, #tpu.memory_space<vmem>>, vector<128x128xbf16>
    %cst_7 = arith.constant dense<0.000000e+00> : vector<128x128xf32>
    %10 = tpu.matmul %8, %9, %cst_7 {dimension_numbers = #tpu.dot_dimension_numbers<[1], [0], [0], [1], [0, 0, 1, 1], [], []>} : vector<128x128xbf16>, vector<128x128xbf16>, vector<128x128xf32> -> vector<128x128xf32>
    %c0_8 = arith.constant 0 : index
    %c0_9 = arith.constant 0 : index
    %11 = vector.load %arg5[%c0_8, %c0_9] : memref<1x128xf32, #tpu.memory_space<vmem>>, vector<1x128xf32>
    %12 = vector.broadcast %11 : vector<1x128xf32> to vector<128x128xf32>
    %13 = arith.addf %10, %12 : vector<128x128xf32>
    %14 = math.tanh %13 : vector<128x128xf32>
    %c0_10 = arith.constant 0 : index
    %c0_11 = arith.constant 0 : index
    %15 = vector.load %arg6[%c0_10, %c0_11] : memref<128x128xf32, #tpu.memory_space<vmem>>, vector<128x128xf32>
    tpu.vector_store %arg6[%c0_10, %c0_11], %14 {strides = array<i32>} : memref<128x128xf32, #tpu.memory_space<vmem>>, vector<128x128xf32>,
    return
  }
  func.func @transform_0(%arg0: i32) -> (i32, i32) {
    %c0_i32 = arith.constant 0 : i32
    %c0_i32_0 = arith.constant 0 : i32
    return %arg0, %c0_i32 : i32, i32
  }
  func.func @transform_1(%arg0: i32) -> (i32, i32) {
    %c0_i32 = arith.constant 0 : i32
    %c0_i32_0 = arith.constant 0 : i32
    %c0_i32_1 = arith.constant 0 : i32
    return %c0_i32, %c0_i32_0 : i32, i32
  }
  func.func @transform_2(%arg0: i32) -> (i32, i32) {
    %c0_i32 = arith.constant 0 : i32
    %c0_i32_0 = arith.constant 0 : i32
    %c0_i32_1 = arith.constant 0 : i32
    return %c0_i32, %c0_i32_0 : i32, i32
  }
  func.func @transform_3(%arg0: i32) -> (i32, i32) {
    %c0_i32 = arith.constant 0 : i32
    %c0_i32_0 = arith.constant 0 : i32
    %c0_i32_1 = arith.constant 0 : i32
    return %c0_i32, %c0_i32_0 : i32, i32
  }
  func.func @transform_4(%arg0: i32) -> (i32, i32) {
    %c0_i32 = arith.constant 0 : i32
    %c0_i32_0 = arith.constant 0 : i32
    %c0_i32_1 = arith.constant 0 : i32
    return %c0_i32, %c0_i32_0 : i32, i32
  }
  func.func @transform_5(%arg0: i32) -> (i32, i32) {
    %c0_i32 = arith.constant 0 : i32
    %c0_i32_0 = arith.constant 0 : i32
    return %arg0, %c0_i32 : i32, i32
  }
}

</mosaic_0001>

<bundles_post_ra>
// kernel: tpu_custom_call.1
= control target key start
LH: loop header
LB: loop body
LE: loop exit
PB: predicated region body
PF: predicated region fallthrough
CT: control target
= control target key end

     0   :  { %10 = vsyncpa [#allocation3], 0  ;;  %s1221_s0 = inlined_call_operand.vmem [shape: f32[256,16], index: 0, kind: input, shape index: {}]   ;;  %s1222_s1 = inlined_call_operand.vmem [shape: bf16[16,128], index: 1, kind: input, shape index: {}]   ;;  %s1223_s2 = inlined_call_operand.vmem [shape: f32[1,128], index: 2, kind: input, shape index: {}]   ;;  %s1224_s3 = inlined_call_operand.vmem [shape: bf16[128,128], index: 3, kind: input, shape index: {}]   ;;  %s1225_s4 = inlined_call_operand.vmem [shape: f32[1,128], index: 4, kind: input, shape index: {}]   ;;  %s1226_s5 = inlined_call_operand.hbm [shape: f32[256,128], index: 5, kind: output, shape index: {}]  }
   0x1   :  { %12 = vsyncpa [#allocation3 + $0x1], 0  ;;  %s1020_s18 = smov 0   ;;  %s1022_s19 = smov 0  }
   0x2   :  { %s1024_s20 = smov 0   ;;  %s1026_s21 = smov 0  }
   0x3 LB: > { %s1041_s22 = sadd.s32 4294967295, %s985_s21   ;;  %s688_s23 = sadd.s32 4294967294, %s985_s21   ;;  %s985_s21 = sphi %s1026_s21, %s1232_s21   ;;  %s981_s20 = sphi %s1024_s20, %s1231_s20   ;;  %s977_s19 = sphi %s1022_s19, %s1230_s19   ;;  %s973_s18 = sphi %s1020_s18, %s1229_s18  }
   0x4   : > { %s1045_s24 = sadd.s32 1, %s985_s21   ;;  %s135_s25 = sadd.s32 1, %s981_s20 }
   0x5   : > { %s132_s26 = ssub.s32 %s985_s21, %s1045_s24  ;;  %p145_p0 = scmp.ne.s32.totalorder %s981_s20, %s977_s19 }
   0x6   : > { %p133_p1 = scmp.eq.s32.totalorder %s132_s26, 0  ;;  %p146_p2 = scmp.eq.s32.totalorder %s1041_s22, 1 }
   0x7   : > { %p151_p3 = scmp.ne.s32.totalorder %s977_s19, %s973_s18  ;;  %p152_p4 = scmp.eq.s32.totalorder %s688_s23, 1 }
   0x8   : > { %s1056_s27 = scalar_select %p133_p1, %s981_s20, %s135_s25  }
   0x9   : > { %p1058_p5 = por %p146_p2, %p145_p0  ;;  %p1062_p6 = por %p152_p4, %p151_p3 }
   0xa   : > { %p691_p7 = scmp.ge.s32.totalorder %s985_s21, 1  ;;  %p191_p8 = scmp.lt.s32.totalorder %s985_s21, 3 }
   0xc   : > { %p192_p9 = pnand %p691_p7, %p191_p8 }
   0xd   : > { %s693_s7 = sshll.u32 (!%p192_p9), %s1041_s22, 4  ;;  %s216_s16 = sand.u32 (!%p192_p9), 1, %s977_s19  }
   0xe   : > { %195 = sbr.rel (%p192_p9) target bundleno = 497 (0x1f1), region = 40  ;;  %p220_p10 = scmp.lt.s32.totalorder (!%p192_p9), %s693_s7, 31 }
   0xf   : > { %s692_s17 = sshll.u32 (!%p192_p9), %s216_s16, 7  ;;  %s719_s25 = sshll.u32 (!%p192_p9), %s1041_s22, 11 }
  0x10   : > { %s1144_s23 = scalar_lea.vmem (!%p192_p9), [#allocation2], %s692_s17  ;;  %s1181_s8 = scalar_lea.sflag (!%p192_p9), [#allocation3], %s216_s16 }
  0x11   : > { %s626_s26 = sshll.u32 (!%p192_p9), %s1144_s23, 4  ;;  %s987_s9 = smov (!%p192_p9), [#allocation2]   ;;  %s1175_s26 = int_to_ptr.vmem [resolvable:$true] %s626_s26 }
  0x12   : > { %s925_s22 = scalar_lea.vmem (!%p192_p9), %s1175_s26, 2048  ;;  %s929_s10 = sshll.u32 (!%p192_p9), %s987_s9, 4  ;;  %s930_s10 = int_to_ptr.vmem [resolvable:$false] %s929_s10 }
  0x13   : > { %v852_v0 = vld [vmem:[%s1222_s1] sm:$0xff]   ;;  %v853_v1 = vld [vmem:[%s1224_s3 + $0x38] sm:$0xff]   ;;  %s1234_s7 = smov (!%p220_p10, %s693_s7), 31  ;;  %v854_v2 = vld [vmem:[%s1224_s3 + $0x30] sm:$0xff]   ;;  %vm266_vm0 = vcmask 130048   ;;  %p926_p11 = scmp.ne.s32.totalorder %s1175_s26, %s925_s22 }
  0x14   : > { %745 = vmatprep.subr.bf16.mxu0 %v852_v0  ;;  %795 = vmatprep.subr.bf16.mxu1 %v853_v1  ;;  %s694_s12 = sshll.u32 %s1234_s7, 3  ;;  %v855_v27 = vld [vmem:[%s1224_s3 + $0x28] sm:$0xff]   ;;  %v856_v28 = vld [vmem:[%s1224_s3 + $0x20] sm:$0xff]   ;;  %v857_v29 = vld [vmem:[%s1224_s3 + $0x18] sm:$0xff]   ;;  %s1173_s7 = scalar_lea.hbm %s1226_s5, %s719_s25 }
  0x15   : > { %746 = vmatpush3.bf16.msra.mxu0 %v852_v0  ;;  %803 = vmatpush3.bf16.msra.mxu1 %v853_v1  ;;  %s1081_s15 = scalar_lea.vmem %s1221_s0, %s694_s12  ;;  %v858_v30 = vld [vmem:[%s1224_s3 + $0x10] sm:$0xff]   ;;  %v859_v31 = vld [vmem:[%s1224_s3 + $0x8] sm:$0xff]   ;;  %v860_v32 = vld [vmem:[%s1224_s3] sm:$0xff]   ;;  %p927_p12 = pnand %p926_p11, %p1058_p5 }
  0x16   : > { %763 = vmatprep.subr.bf16.mxu0 %v853_v1  ;;  %796 = vmatprep.subr.bf16.mxu1 %v854_v2  ;;  %v227_v3 = vld [vmem:[%s1081_s15] sm:$0xff]  ;;  %v228_v4 = vld [vmem:[%s1081_s15 + $0x8] sm:$0xff]  ;;  %v229_v5 = vld [vmem:[%s1081_s15 + $0x10] sm:$0xff]  ;;  %s931_s11 = scalar_lea.vmem %s930_s10, 4096  ;;  %p932_p0 = scmp.lt.s32.totalorder %s1175_s26, %s930_s10 }
  0x17   : > { %v243_v6 = vpack.c.bf16 %v228_v4, %v227_v3  ;;  %v230_v7 = vld [vmem:[%s1081_s15 + $0x18] sm:$0xff]  ;;  %v231_v8 = vld [vmem:[%s1081_s15 + $0x20] sm:$0xff]  ;;  %v232_v9 = vld [vmem:[%s1081_s15 + $0x28] sm:$0xff]  ;;  %p928_p13 = pneg %p927_p12  ;;  %p933_p1 = scmp.lt.s32.totalorder %s931_s11, %s925_s22 }
  0x18   : > { %v244_v10 = vpack.c.bf16 %v230_v7, %v229_v5  ;;  %v245_v11 = vpack.c.bf16 %v232_v9, %v231_v8  ;;  %v233_v12 = vld [vmem:[%s1081_s15 + $0x30] sm:$0xff]  ;;  %v234_v13 = vld [vmem:[%s1081_s15 + $0x38] sm:$0xff]  ;;  %v235_v14 = vld [vmem:[%s1081_s15 + $0x40] sm:$0xff] }
  0x19   : > { %804 = vmatpush3.bf16.msra.mxu1 %v854_v2  ;;  %747 = vmatprep.mubr.msk.bf16.mxu0 %vm266_vm0, %v243_v6  ;;  %v236_v15 = vld [vmem:[%s1081_s15 + $0x48] sm:$0xff]  ;;  %v246_v16 = vpack.c.bf16 %v234_v13, %v233_v12  ;;  %v237_v18 = vld [vmem:[%s1081_s15 + $0x50] sm:$0xff]  ;;  %v238_v19 = vld [vmem:[%s1081_s15 + $0x58] sm:$0xff]  ;;  %p934_p2 = por %p933_p1, %p932_p0 }
  0x1a   : > { %748 = vmatmul.mubr.msk.bf16.vlgmr.msra.gmra.mxu0 %vm266_vm0, %v244_v10  ;;  %v247_v17 = vpack.c.bf16 %v236_v15, %v235_v14  ;;  %v239_v20 = vld [vmem:[%s1081_s15 + $0x60] sm:$0xff]  ;;  %v240_v21 = vld [vmem:[%s1081_s15 + $0x68] sm:$0xff]  ;;  %v248_v22 = vpack.c.bf16 %v238_v19, %v237_v18  ;;  %v241_v24 = vld [vmem:[%s1081_s15 + $0x70] sm:$0xff]  ;;  %797 = vmatprep.subr.bf16.mxu1 %v855_v27 }
  0x1b   : > { %751 = vmatprep.mubr.msk.bf16.mxu0 %vm266_vm0, %v245_v11  ;;  %764 = vmatpush3.bf16.msra.mxu0 %v853_v1  ;;  %v249_v23 = vpack.c.bf16 %v240_v21, %v239_v20  ;;  %v242_v25 = vld [vmem:[%s1081_s15 + $0x78] sm:$0xff]  ;;  %v695_v34 = vld [vmem:[%s1223_s2] ss:$0 sm:$0xff]  ;;  %p935_p3 = pnand %p934_p2, %p928_p13 }
  0x1c   : > { %765 = vmatprep.subr.bf16.mxu0 %v854_v2  ;;  %v250_v26 = vpack.c.bf16 %v242_v25, %v241_v24 }
  0x1d   : > { %805 = vmatpush3.bf16.msra.mxu1 %v855_v27 }
  0x1e   : > { %798 = vmatprep.subr.bf16.mxu1 %v856_v28 }
  0x1f   : > { %766 = vmatpush3.bf16.msra.mxu0 %v854_v2 }
  0x20   : > { %767 = vmatprep.subr.bf16.mxu0 %v855_v27 }
  0x21   : > { %806 = vmatpush3.bf16.msra.mxu1 %v856_v28 }
  0x22   : > { %752 = vmatmul.mubr.msk.bf16.gmra.mxu0 %vm266_vm0, %v246_v16  ;;  %799 = vmatprep.subr.bf16.mxu1 %v857_v29 }
  0x23   : > { %755 = vmatprep.mubr.msk.bf16.mxu0 %vm266_vm0, %v247_v17  ;;  %768 = vmatpush3.bf16.msra.mxu0 %v855_v27 }
  0x24   : > { %769 = vmatprep.subr.bf16.mxu0 %v856_v28 }
  0x25   : > { %807 = vmatpush3.bf16.msra.mxu1 %v857_v29 }
  0x26   : > { %800 = vmatprep.subr.bf16.mxu1 %v858_v30 }
  0x27   : > { %770 = vmatpush3.bf16.msra.mxu0 %v856_v28 }
  0x28   : > { %771 = vmatprep.subr.bf16.mxu0 %v857_v29 }
  0x29   : > { %808 = vmatpush3.bf16.msra.mxu1 %v858_v30 }
  0x2a   : > { %756 = vmatmul.mubr.msk.bf16.gmra.mxu0 %vm266_vm0, %v248_v22  ;;  %801 = vmatprep.subr.bf16.mxu1 %v859_v31 }
  0x2b   : > { %759 = vmatprep.mubr.msk.bf16.mxu0 %vm266_vm0, %v249_v23  ;;  %772 = vmatpush3.bf16.msra.mxu0 %v857_v29 }
  0x2c   : > { %773 = vmatprep.subr.bf16.mxu0 %v858_v30 }
  0x2d   : > { %809 = vmatpush3.bf16.msra.mxu1 %v859_v31 }
  0x2e   : > { %802 = vmatprep.subr.bf16.mxu1 %v860_v32 }
  0x2f   : > { %774 = vmatpush3.bf16.msra.mxu0 %v858_v30 }
  0x30   : > { %775 = vmatprep.subr.bf16.mxu0 %v859_v31 }
  0x31   : > { %810 = vmatpush3.bf16.msra.mxu1 %v860_v32 }
  0x32   : > { %760 = vmatmul.mubr.msk.bf16.gmra.mxu0 %vm266_vm0, %v250_v26  ;;  %v1131_v26 = vld [vmem:[%s1225_s4] ss:$0 sm:$0xff] }
  0x33   : > { %776 = vmatpush3.bf16.msra.mxu0 %v859_v31 }
  0x34   : > { %777 = vmatprep.subr.bf16.mxu0 %v860_v32 }
  0x37   : > { %778 = vmatpush3.bf16.msra.mxu0 %v860_v32 }
  0xda   : > { %v749_v33 = vpop.f32.mrf.mxu0 }
  0xdb   : > { %v334_v39 = vadd.f32 %v749_v33, %v695_v34 }
  0xdc   : > { %v325_v35 = vpop.f32.mrf.mxu0 }
  0xdd   : > { %v326_v36 = vadd.f32 %v695_v34, %v325_v35 }
  0xde   : > { %v750_v37 = vpop.f32.mrf.mxu0 }
  0xdf   : > { %v337_v38 = vadd.f32 %v750_v37, %v695_v34  ;;  %861 = vtanh.f32 %v326_v36 }
  0xe0   : > { %v328_v40 = vpop.f32.mrf.mxu0 }
  0xe1   : > { %v329_v41 = vadd.f32 %v695_v34, %v328_v40  ;;  %863 = vtanh.f32 %v337_v38 }
  0xe2   : > { %v753_v42 = vpop.f32.mrf.mxu0 }
  0xe3   : > { %865 = vtanh.f32 %v329_v41  ;;  %v350_v47 = vadd.f32 %v753_v42, %v695_v34 }
  0xe4   : > { %867 = vtanh.f32 %v334_v39  ;;  %v341_v43 = vpop.f32.mrf.mxu0 }
  0xe5   : > { %v342_v44 = vadd.f32 %v695_v34, %v341_v43 }
  0xe6   : > { %v754_v45 = vpop.f32.mrf.mxu0 }
  0xe7   : > { %v353_v46 = vadd.f32 %v754_v45, %v695_v34  ;;  %869 = vtanh.f32 %v342_v44 }
  0xe8   : > { %v344_v48 = vpop.f32.mrf.mxu0 }
  0xe9   : > { %v345_v49 = vadd.f32 %v695_v34, %v344_v48  ;;  %871 = vtanh.f32 %v353_v46 }
  0xea   : > { %v757_v50 = vpop.f32.mrf.mxu0 }
  0xeb   : > { %873 = vtanh.f32 %v345_v49  ;;  %v366_v58 = vadd.f32 %v757_v50, %v695_v34 }
  0xec   : > { %875 = vtanh.f32 %v350_v47  ;;  %v357_v51 = vpop.f32.mrf.mxu0  ;;  %v862_v53 = vpop.eup %861 }
  0xed   : > { %v358_v52 = vadd.f32 %v695_v34, %v357_v51 }
  0xee   : > { %v758_v54 = vpop.f32.mrf.mxu0  ;;  %v864_v55 = vpop.eup %863 }
  0xef   : > { %v369_v56 = vadd.f32 %v758_v54, %v695_v34  ;;  %877 = vtanh.f32 %v358_v52 }
  0xf0   : > { %v866_v57 = vpop.eup %865  ;;  %v360_v59 = vpop.f32.mrf.mxu0 }
  0xf1   : > { %v868_v60 = vpop.eup %867  ;;  %v361_v61 = vadd.f32 %v695_v34, %v360_v59  ;;  %v404_v62 = vpack.c.bf16 %v866_v57, %v862_v53  ;;  %879 = vtanh.f32 %v369_v56 }
  0xf2   : > { %v761_v63 = vpop.f32.mrf.mxu0  ;;  %v405_v0 = vpack.c.bf16 %v864_v55, %v868_v60 }
  0xf3   : > { %881 = vtanh.f32 %v361_v61  ;;  %779 = vmatprep.mubr.bf16.mxu0 %v404_v62  ;;  %v382_v8 = vadd.f32 %v761_v63, %v695_v34 }
  0xf4   : > { %883 = vtanh.f32 %v366_v58  ;;  %v373_v1 = vpop.f32.mrf.mxu0  ;;  %780 = vmatmul.mubr.bf16.vlgmr.msra.gmra.mxu0 %v405_v0  ;;  %v870_v3 = vpop.eup %869 }
  0xf5   : > { %v374_v2 = vadd.f32 %v695_v34, %v373_v1 }
  0xf6   : > { %v762_v4 = vpop.f32.mrf.mxu0  ;;  %v872_v5 = vpop.eup %871 }
  0xf7   : > { %v385_v6 = vadd.f32 %v762_v4, %v695_v34  ;;  %885 = vtanh.f32 %v374_v2 }
  0xf8   : > { %v874_v7 = vpop.eup %873  ;;  %v376_v9 = vpop.f32.mrf.mxu0 }
  0xf9   : > { %v876_v10 = vpop.eup %875  ;;  %v377_v11 = vadd.f32 %v695_v34, %v376_v9  ;;  %v406_v12 = vpack.c.bf16 %v874_v7, %v870_v3  ;;  %887 = vtanh.f32 %v385_v6 }
  0xfa   : > { %v407_v13 = vpack.c.bf16 %v872_v5, %v876_v10 }
  0xfb   : > { %889 = vtanh.f32 %v377_v11  ;;  %783 = vmatprep.mubr.bf16.mxu1 %v406_v12 }
  0xfc   : > { %891 = vtanh.f32 %v382_v8  ;;  %784 = vmatmul.mubr.bf16.vlgmr.msra.gmra.mxu1 %v407_v13  ;;  %v878_v14 = vpop.eup %877 }
  0xfe   : > { %v880_v15 = vpop.eup %879 }
 0x100   : > { %v882_v16 = vpop.eup %881 }
 0x101   : > { %v884_v17 = vpop.eup %883  ;;  %v408_v18 = vpack.c.bf16 %v882_v16, %v878_v14 }
 0x102   : > { %v409_v19 = vpack.c.bf16 %v880_v15, %v884_v17 }
 0x103   : > { %787 = vmatprep.mubr.bf16.mxu1 %v408_v18 }
 0x104   : > { %788 = vmatmul.mubr.bf16.gmra.mxu1 %v409_v19  ;;  %v886_v20 = vpop.eup %885 }
 0x106   : > { %v888_v21 = vpop.eup %887 }
 0x108   : > { %v890_v22 = vpop.eup %889 }
 0x109   : > { %v892_v23 = vpop.eup %891  ;;  %v410_v24 = vpack.c.bf16 %v890_v22, %v886_v20 }
 0x10a   : > { %v411_v25 = vpack.c.bf16 %v888_v21, %v892_v23 }
 0x10b   : > { %791 = vmatprep.mubr.bf16.mxu1 %v410_v24 }
 0x10c   : > { %792 = vmatmul.mubr.bf16.gmra.mxu1 %v411_v25 }
 0x1b4   : > { %v781_v27 = vpop.f32.mrf.mxu0 }
 0x1b5   : > { %v526_v28 = vadd.f32 %v781_v27, %v1131_v26 }
 0x1b6   : > { %v517_v29 = vpop.f32.mrf.mxu0 }
 0x1b7   : > { %893 = vtanh.f32 %v526_v28  ;;  %v518_v30 = vadd.f32 %v1131_v26, %v517_v29 }
 0x1b8   : > { %v782_v31 = vpop.f32.mrf.mxu0 }
 0x1b9   : > { %895 = vtanh.f32 %v518_v30  ;;  %v529_v32 = vadd.f32 %v782_v31, %v1131_v26 }
 0x1ba   : > { %v520_v33 = vpop.f32.mrf.mxu0 }
 0x1bb   : > { %897 = vtanh.f32 %v529_v32  ;;  %v521_v34 = vadd.f32 %v1131_v26, %v520_v33 }
 0x1bc   : > { %v785_v35 = vpop.f32.mrf.mxu1 }
 0x1bd   : > { %899 = vtanh.f32 %v521_v34  ;;  %v542_v36 = vadd.f32 %v785_v35, %v1131_v26 }
 0x1be   : > { %v533_v37 = vpop.f32.mrf.mxu1 }
 0x1bf   : > { %901 = vtanh.f32 %v542_v36  ;;  %v534_v38 = vadd.f32 %v1131_v26, %v533_v37 }
 0x1c0   : > { %v786_v39 = vpop.f32.mrf.mxu1 }
 0x1c1   : > { %903 = vtanh.f32 %v534_v38  ;;  %v545_v40 = vadd.f32 %v786_v39, %v1131_v26 }
 0x1c2   : > { %v536_v41 = vpop.f32.mrf.mxu1 }
 0x1c3   : > { %905 = vtanh.f32 %v545_v40  ;;  %v537_v42 = vadd.f32 %v1131_v26, %v536_v41 }
 0x1c4   : > { %v894_v43 = vpop.eup %893  ;;  %v789_v44 = vpop.f32.mrf.mxu1 }
 0x1c5   : > { %598 = vst [vmem:[%s1144_s23 + $0x10] sm:$0xff] %v894_v43  ;;  %907 = vtanh.f32 %v537_v42  ;;  %v558_v45 = vadd.f32 %v789_v44, %v1131_v26 }
 0x1c6   : > { %v896_v46 = vpop.eup %895  ;;  %v549_v47 = vpop.f32.mrf.mxu1 }
 0x1c7   : > { %596 = vst [vmem:[%s1144_s23] sm:$0xff] %v896_v46  ;;  %909 = vtanh.f32 %v558_v45  ;;  %v550_v48 = vadd.f32 %v1131_v26, %v549_v47 }
 0x1c8   : > { %v898_v49 = vpop.eup %897  ;;  %v790_v50 = vpop.f32.mrf.mxu1 }
 0x1c9   : > { %599 = vst [vmem:[%s1144_s23 + $0x18] sm:$0xff] %v898_v49  ;;  %911 = vtanh.f32 %v550_v48  ;;  %v561_v51 = vadd.f32 %v790_v50, %v1131_v26 }
 0x1ca   : > { %v900_v52 = vpop.eup %899  ;;  %v552_v53 = vpop.f32.mrf.mxu1 }
 0x1cb   : > { %597 = vst [vmem:[%s1144_s23 + $0x8] sm:$0xff] %v900_v52  ;;  %913 = vtanh.f32 %v561_v51  ;;  %v553_v54 = vadd.f32 %v1131_v26, %v552_v53 }
 0x1cc   : > { %v902_v55 = vpop.eup %901  ;;  %v793_v56 = vpop.f32.mrf.mxu1 }
 0x1cd   : > { %602 = vst [vmem:[%s1144_s23 + $0x30] sm:$0xff] %v902_v55  ;;  %915 = vtanh.f32 %v553_v54  ;;  %v574_v57 = vadd.f32 %v793_v56, %v1131_v26 }
 0x1ce   : > { %v904_v58 = vpop.eup %903  ;;  %v565_v59 = vpop.f32.mrf.mxu1 }
 0x1cf   : > { %600 = vst [vmem:[%s1144_s23 + $0x20] sm:$0xff] %v904_v58  ;;  %917 = vtanh.f32 %v574_v57  ;;  %v566_v60 = vadd.f32 %v1131_v26, %v565_v59 }
 0x1d0   : > { %v906_v61 = vpop.eup %905  ;;  %v794_v62 = vpop.f32.mrf.mxu1 }
 0x1d1   : > { %603 = vst [vmem:[%s1144_s23 + $0x38] sm:$0xff] %v906_v61  ;;  %919 = vtanh.f32 %v566_v60  ;;  %v577_v63 = vadd.f32 %v794_v62, %v1131_v26 }
 0x1d2   : > { %v908_v0 = vpop.eup %907  ;;  %v568_v1 = vpop.f32.mrf.mxu1 }
 0x1d3   : > { %601 = vst [vmem:[%s1144_s23 + $0x28] sm:$0xff] %v908_v0  ;;  %921 = vtanh.f32 %v577_v63  ;;  %v569_v2 = vadd.f32 %v1131_v26, %v568_v1 }
 0x1d4   : > { %v910_v3 = vpop.eup %909 }
 0x1d5   : > { %606 = vst [vmem:[%s1144_s23 + $0x50] sm:$0xff] %v910_v3  ;;  %923 = vtanh.f32 %v569_v2 }
 0x1d6   : > { %v912_v4 = vpop.eup %911 }
 0x1d7   : > { %604 = vst [vmem:[%s1144_s23 + $0x40] sm:$0xff] %v912_v4 }
 0x1d8   : > { %v914_v5 = vpop.eup %913 }
 0x1d9   : > { %607 = vst [vmem:[%s1144_s23 + $0x58] sm:$0xff] %v914_v5 }
 0x1da   : > { %v916_v6 = vpop.eup %915 }
 0x1db   : > { %605 = vst [vmem:[%s1144_s23 + $0x48] sm:$0xff] %v916_v6 }
 0x1dc   : > { %v918_v7 = vpop.eup %917 }
 0x1dd   : > { %610 = vst [vmem:[%s1144_s23 + $0x70] sm:$0xff] %v918_v7 }
 0x1de   : > { %v920_v8 = vpop.eup %919 }
 0x1df   : > { %608 = vst [vmem:[%s1144_s23 + $0x60] sm:$0xff] %v920_v8 }
 0x1e0   : > { %v922_v9 = vpop.eup %921 }
 0x1e1   : > { %611 = vst [vmem:[%s1144_s23 + $0x78] sm:$0xff] %v922_v9 }
 0x1e2   : > { %v924_v10 = vpop.eup %923 }
 0x1e3   : > { %609 = vst [vmem:[%s1144_s23 + $0x68] sm:$0xff] %v924_v10 }
 0x1e4   : > { %938 = shalt.err (!%p935_p3)
}
 0x1e5   : > { %s939_s12 = scalar_lea.hbm %s1173_s7, 2048  ;;  %s943_s15 = scalar_lea.hbm %s1226_s5, 4096 }
 0x1e6   : > { %p940_p4 = scmp.ne.s32.totalorder %s1173_s7, %s939_s12  ;;  %p944_p9 = scmp.lt.s32.totalorder %s1173_s7, %s1226_s5 }
 0x1e7   : > { %p945_p10 = scmp.lt.s32.totalorder %s943_s15, %s939_s12 }
 0x1e8   : > { %p941_p7 = pnand %p940_p4, %p1058_p5 }
 0x1e9   : > { %p946_p11 = por %p945_p10, %p944_p9 }
 0x1ea   : > { %p942_p8 = pneg %p941_p7 }
 0x1ec   : > { %p947_p12 = pnand %p946_p11, %p942_p8 }
 0x1ee   : > { %950 = shalt.err (!%p947_p12)
}
 0x1ef   : > { %s988_s23 = smov 128   ;;  %s989_s25 = smov 8  }
 0x1f0   : > { %811 = dma.vmem_to_hbm [thread:$0]  (%p1058_p5), %s1175_s26, 2048, %s1173_s7, %s1181_s8, %s988_s23, %s988_s23, %s989_s25  }
 0x1f1 PF: > { %p817_p13 = scmp.ge.s32.totalorder %s985_s21, 2  ;;  %s641_s30 = sand.u32 1, %s973_s18  }
 0x1f2   : > { %s642_s6 = scalar_lea.sflag [#allocation3], %s641_s30 }
 0x1f3   : > { %p814_p0 = pnand %p817_p13, %p1062_p6 }
 0x1f5   : > { %p815_p1 = pneg %p814_p0 }
 0x1f7   : > { %968 = dma.done.wait (%p815_p1), %s642_s6, 2048  }
 0x1f8   : > { %970 = vsyncadd (%p815_p1), %s642_s6, 4294965248  ;;  %p15_p2 = scmp.ge.s32.totalorder %s1045_s24, 4   ;;  %s1229_s18 = smov %s977_s19 }
 0x1f9   : > { %s1230_s19 = smov %s981_s20  ;;  %s1231_s20 = smov %s1056_s27 }
 0x1fa   : > { %s1232_s21 = smov %s1045_s24  ;;  %17 = sbr.rel (!%p15_p2) target bundleno = 3 (0x3), region = 75 }
 0x1ff   :  { %647 = vsyncpa [#allocation3], 1 }
 0x200   :  { %649 = vsyncpa [#allocation3 + $0x1], 1 }

</bundles_post_ra>
